<compile_context>
chip_gen: v5e
topology: v5e:2x2
jax: 0.10.0
libtpu: 0.0.40
codegen_flags: <defaults>
</compile_context>

<pallas_src>
import functools

import jax
import jax.numpy as jnp
from jax.experimental import pallas as pl
from jax.experimental.pallas import tpu as pltpu


def _round_up(x, m):
    return ((x + m - 1) // m) * m


# ---------------------------------------------------------------------------
# Kernel
# ---------------------------------------------------------------------------
def _conv_bn_relu(slabs, w_ref, b_ref):
    """One folded conv block: 4 per-tap MXU matmuls accumulated in f32,
    then bias + ReLU (BN scale is already folded into w_ref)."""
    acc = jnp.dot(slabs[0], w_ref[0], preferred_element_type=jnp.float32)
    for t in range(1, 4):
        acc = acc + jnp.dot(slabs[t], w_ref[t],
                            preferred_element_type=jnp.float32)
    return jnp.maximum(acc + b_ref[...], 0.0)


def _down_head_8x_kernel(x_ref, w1_ref, b1_ref, w2_ref, b2_ref, w3_ref,
                         b3_ref, o_ref):
    """x_ref : (64, TM, C0) input pixels; leading index u = 16*t0 + 4*t1 + t2,
               where t_l = 2*kh + kw is the 2x2 tap consumed by conv layer l.
       w*_ref: (4, Cin, Cout) BN-folded per-tap weights (compute dtype).
       b*_ref: (1, Cout)      folded bias (conv bias + BN shift), f32.
       o_ref : (TM, C3)       final activations, rows = (n, ho, wo) row-major.
    """
    tm = x_ref.shape[1]
    c0 = x_ref.shape[2]
    cdt = w1_ref.dtype  # compute dtype fed to the MXU (bf16 by default)

    # Layer 1: tap t0 = leading indices [16*t0, 16*(t0+1)).
    slabs = [x_ref[16 * t:16 * (t + 1), :, :].reshape(16 * tm, c0)
             for t in range(4)]
    y = _conv_bn_relu(slabs, w1_ref, b1_ref).astype(cdt)      # (16*TM, C1)

    # Layer 2: tap t1 = contiguous row block of 4*TM.
    slabs = [y[4 * tm * t:4 * tm * (t + 1), :] for t in range(4)]
    y = _conv_bn_relu(slabs, w2_ref, b2_ref).astype(cdt)      # (4*TM, C2)

    # Layer 3: tap t2 = contiguous row block of TM.
    slabs = [y[tm * t:tm * (t + 1), :] for t in range(4)]
    y = _conv_bn_relu(slabs, w3_ref, b3_ref)                  # (TM, C3), f32
    o_ref[...] = y.astype(o_ref.dtype)


# ---------------------------------------------------------------------------
# Wrapper
# ---------------------------------------------------------------------------
def _fold_conv_bn(w_oihw, conv_b, gamma, beta, mean, var, eps, compute_dtype):
    """Fold eval-mode BN into the conv: returns per-tap weights [4, Cin, Cout]
    (tap t = 2*kh + kw, matching PyTorch OIHW) and a (1, Cout) f32 bias."""
    cout, cin = int(w_oihw.shape[0]), int(w_oihw.shape[1])
    scale = gamma / jnp.sqrt(var + eps)                       # (Cout,)
    w_tap = jnp.transpose(w_oihw, (2, 3, 1, 0)).reshape(4, cin, cout)
    w_folded = (w_tap * scale[None, None, :]).astype(compute_dtype)
    bias = (beta + scale * (conv_b - mean)).reshape(1, cout).astype(jnp.float32)
    return w_folded, bias


def _choose_row_tiling(m3, max_tile=1024):
    """Pick (tile_rows, padded_rows): tile is a multiple of 8, and the grid
    gets >=2 steps whenever there is enough work (v7x megacore)."""
    m_aligned = _round_up(max(m3, 1), 8)
    steps = max(1, -(-m_aligned // max_tile))
    if steps == 1 and m_aligned >= 16:
        steps = 2
    tm = _round_up(-(-m_aligned // steps), 8)
    return tm, _round_up(m3, tm)


def down_head_8x_pallas(x_nchw, params, *, eps=1e-3,
                        compute_dtype=jnp.bfloat16):
    """Forward pass of DownHead8x (inference / BN eval mode)."""
    # TODO(synk): BatchNorm2d is implemented in eval mode (running stats),
    # not training-mode batch statistics.
    N, C0, H, W = x_nchw.shape
    assert H >= 8 and W >= 8, "DownHead8x needs at least 8x8 spatial input"
    Hf, Wf = H // 8, W // 8
    # Three k=2/s=2 floor-strided convs only ever read the first 8*Hf rows /
    # 8*Wf cols, so cropping is exactly equivalent to PyTorch semantics.
    x = x_nchw[:, :, :8 * Hf, :8 * Wf]

    # One-time layout prep (plain JAX): rows ordered (t0, t1, t2, n, hq, wq)
    # with channels innermost, so the lane dim stays dense in C everywhere.
    p = jnp.transpose(x, (0, 2, 3, 1))                        # NHWC
    p = p.reshape(N, Hf, 2, 2, 2, Wf, 2, 2, 2, C0)
    #            n  hq h2 h1 h0 wq w2 w1 w0 c
    p = jnp.transpose(p, (4, 8, 3, 7, 2, 6, 0, 1, 5, 9))      # (h0,w0,h1,w1,h2,w2,n,hq,wq,c)
    m3 = N * Hf * Wf
    p = p.reshape(64, m3, C0)

    tm, m3p = _choose_row_tiling(m3)
    if m3p != m3:
        p = jnp.pad(p, ((0, 0), (0, m3p - m3), (0, 0)))       # padded rows are discarded
    p = p.astype(compute_dtype)

    w1, b1 = _fold_conv_bn(params[0]["w"], params[0]["b"], params[0]["gamma"],
                           params[0]["beta"], params[0]["mean"],
                           params[0]["var"], eps, compute_dtype)
    w2, b2 = _fold_conv_bn(params[1]["w"], params[1]["b"], params[1]["gamma"],
                           params[1]["beta"], params[1]["mean"],
                           params[1]["var"], eps, compute_dtype)
    w3, b3 = _fold_conv_bn(params[2]["w"], params[2]["b"], params[2]["gamma"],
                           params[2]["beta"], params[2]["mean"],
                           params[2]["var"], eps, compute_dtype)
    C1, C2, C3 = int(w1.shape[2]), int(w2.shape[2]), int(w3.shape[2])

    itemsize = jnp.dtype(compute_dtype).itemsize
    est_step_bytes = (2 * 64 * tm * C0 * itemsize             # input block, double-buffered
                      + 2 * tm * C3 * 4                       # output block
                      + 4 * (C0 * C1 + C1 * C2 + C2 * C3) * itemsize
                      + tm * (16 * C1 + 4 * C2 + C3) * 4)     # f32 intermediates
    # Explicit VMEM budget; stays well inside v7x's 64 MiB physical VMEM.
    vmem_limit = int(min(max(4 * est_step_bytes, 16 << 20), 48 << 20))

    out = pl.pallas_call(
        _down_head_8x_kernel,
        out_shape=jax.ShapeDtypeStruct((m3p, C3), x_nchw.dtype),
        grid=(m3p // tm,),
        in_specs=[
            pl.BlockSpec((64, tm, C0), lambda i: (0, i, 0)),
            pl.BlockSpec((4, C0, C1), lambda i: (0, 0, 0)),
            pl.BlockSpec((1, C1), lambda i: (0, 0)),
            pl.BlockSpec((4, C1, C2), lambda i: (0, 0, 0)),
            pl.BlockSpec((1, C2), lambda i: (0, 0)),
            pl.BlockSpec((4, C2, C3), lambda i: (0, 0, 0)),
            pl.BlockSpec((1, C3), lambda i: (0, 0)),
        ],
        # Only the final layer writes HBM thanks to fusion; C3 < 128 lanes
        # still means masked stores, but it is 1x (not 3x) tiny writebacks.
        out_specs=pl.BlockSpec((tm, C3), lambda i: (i, 0)),
        compiler_params=pltpu.CompilerParams(
            dimension_semantics=("parallel",),
            vmem_limit_bytes=vmem_limit,
        ),
    )(p, w1, b1, w2, b2, w3, b3)

    out = out[:m3].reshape(N, Hf, Wf, C3)
    return jnp.transpose(out, (0, 3, 1, 2))                   # back to NCHW


@functools.partial(jax.jit, static_argnames=("compute_dtype",))
def down_head_8x_forward(x, params, compute_dtype=jnp.bfloat16):
    return down_head_8x_pallas(x, params, compute_dtype=compute_dtype)


# ---------------------------------------------------------------------------
# Params / reference
# ---------------------------------------------------------------------------
def init_down_head_8x_params(key, out_channels):
    """Channel progression: out/8 -> out/4 -> out/2 -> out (three conv blocks)."""
    chans = [out_channels // 8, out_channels // 4, out_channels // 2, out_channels]
    params = []
    for li in range(3):
        cin, cout = chans[li], chans[li + 1]
        key, kw, kb, kg, kbt, km, kv = jax.random.split(key, 7)
        fan_in = cin * 2 * 2
        w = jax.random.normal(kw, (cout, cin, 2, 2), jnp.float32) / jnp.sqrt(fan_in)
        b = 0.01 * jax.random.normal(kb, (cout,), jnp.float32)
        gamma = 1.0 + 0.1 * jax.random.normal(kg, (cout,), jnp.float32)
        beta = 0.1 * jax.random.normal(kbt, (cout,), jnp.float32)
        mean = 0.1 * jax.random.normal(km, (cout,), jnp.float32)
        var = 1.0 + 0.1 * jax.random.uniform(kv, (cout,), jnp.float32)
        params.append(dict(w=w, b=b, gamma=gamma, beta=beta, mean=mean, var=var))
    return params


def reference_forward(x, params, eps=1e-3):
    """Pure-JAX reference (lax.conv, full precision) for correctness checks."""
    for p in params:
        x = jax.lax.conv_general_dilated(
            x, p["w"], window_strides=(2, 2), padding="VALID",
            dimension_numbers=("NCHW", "OIHW", "NCHW"),
            precision=jax.lax.Precision.HIGHEST)
        x = x + p["b"][None, :, None, None]
        scale = p["gamma"] / jnp.sqrt(p["var"] + eps)
        x = scale[None, :, None, None] * (x - p["mean"][None, :, None, None]) \
            + p["beta"][None, :, None, None]
        x = jnp.maximum(x, 0.0)
    return x


if __name__ == "__main__":
    out_channels = 32
    in_channels = out_channels // 8          # first conv expects out_channels//8

    key = jax.random.PRNGKey(0)
    key, kx = jax.random.split(key)
    x = jax.random.normal(kx, (2, in_channels, 16, 16), jnp.float32)

    params = init_down_head_8x_params(jax.random.PRNGKey(0), out_channels)
    ref = jax.block_until_ready(reference_forward(x, params))

    # f32 compute path: tight correctness check against the lax.conv reference.
    out_f32 = jax.block_until_ready(
        down_head_8x_forward(x, params, compute_dtype=jnp.float32))
    assert out_f32.shape == (2, out_channels, 2, 2), out_f32.shape
    assert jnp.allclose(out_f32, ref, atol=1e-4, rtol=1e-4), \
        float(jnp.max(jnp.abs(out_f32 - ref)))

    # Default bf16 fast path (MXU-native): relaxed tolerance sanity check.
    out_bf16 = jax.block_until_ready(down_head_8x_forward(x, params))
    assert out_bf16.shape == (2, out_channels, 2, 2), out_bf16.shape
    assert jnp.allclose(out_bf16, ref, atol=5e-2, rtol=5e-2), \
        float(jnp.max(jnp.abs(out_bf16 - ref)))

    print("KERNEL_OK")
</pallas_src>

<mosaic_0001>
module attributes {stable_mosaic.version = 11 : i64} {
  func.func @_down_head_8x_kernel(%arg0: i32, %arg1: memref<64x8x4xf32, #tpu.memory_space<vmem>>, %arg2: memref<4x4x8xf32, #tpu.memory_space<vmem>>, %arg3: memref<1x8xf32, #tpu.memory_space<vmem>>, %arg4: memref<4x8x16xf32, #tpu.memory_space<vmem>>, %arg5: memref<1x16xf32, #tpu.memory_space<vmem>>, %arg6: memref<4x16x32xf32, #tpu.memory_space<vmem>>, %arg7: memref<1x32xf32, #tpu.memory_space<vmem>>, %arg8: memref<8x32xf32, #tpu.memory_space<vmem>>) attributes {dimension_semantics = [#tpu.dimension_semantics<parallel>], iteration_bounds = array<i64: 1>, scalar_prefetch = 0 : i64, scratch_operands = 0 : i64, tpu.core_type = #tpu.core_type<tc>, window_params = [{transform_indices = @transform_0, window_bounds = array<i64: 64, 8, 4>}, {pipeline_mode = #tpu.pipeline_mode<synchronous>, transform_indices = @transform_1, window_bounds = array<i64: 4, 4, 8>}, {pipeline_mode = #tpu.pipeline_mode<synchronous>, transform_indices = @transform_2, window_bounds = array<i64: 1, 8>}, {pipeline_mode = #tpu.pipeline_mode<synchronous>, transform_indices = @transform_3, window_bounds = array<i64: 4, 8, 16>}, {pipeline_mode = #tpu.pipeline_mode<synchronous>, transform_indices = @transform_4, window_bounds = array<i64: 1, 16>}, {pipeline_mode = #tpu.pipeline_mode<synchronous>, transform_indices = @transform_5, window_bounds = array<i64: 4, 16, 32>}, {pipeline_mode = #tpu.pipeline_mode<synchronous>, transform_indices = @transform_6, window_bounds = array<i64: 1, 32>}, {transform_indices = @transform_7, window_bounds = array<i64: 8, 32>}]} {
    %c0 = arith.constant 0 : index
    %c0_0 = arith.constant 0 : index
    %c0_1 = arith.constant 0 : index
    %0 = vector.load %arg1[%c0, %c0_0, %c0_1] : memref<64x8x4xf32, #tpu.memory_space<vmem>>, vector<16x8x4xf32>
    %1 = vector.shape_cast %0 : vector<16x8x4xf32> to vector<128x4xf32>
    %c16 = arith.constant 16 : index
    %c0_2 = arith.constant 0 : index
    %c0_3 = arith.constant 0 : index
    %2 = vector.load %arg1[%c16, %c0_2, %c0_3] : memref<64x8x4xf32, #tpu.memory_space<vmem>>, vector<16x8x4xf32>
    %3 = vector.shape_cast %2 : vector<16x8x4xf32> to vector<128x4xf32>
    %c32 = arith.constant 32 : index
    %c0_4 = arith.constant 0 : index
    %c0_5 = arith.constant 0 : index
    %4 = vector.load %arg1[%c32, %c0_4, %c0_5] : memref<64x8x4xf32, #tpu.memory_space<vmem>>, vector<16x8x4xf32>
    %5 = vector.shape_cast %4 : vector<16x8x4xf32> to vector<128x4xf32>
    %c48 = arith.constant 48 : index
    %c0_6 = arith.constant 0 : index
    %c0_7 = arith.constant 0 : index
    %6 = vector.load %arg1[%c48, %c0_6, %c0_7] : memref<64x8x4xf32, #tpu.memory_space<vmem>>, vector<16x8x4xf32>
    %7 = vector.shape_cast %6 : vector<16x8x4xf32> to vector<128x4xf32>
    %c0_8 = arith.constant 0 : index
    %c0_9 = arith.constant 0 : index
    %c0_10 = arith.constant 0 : index
    %8 = vector.load %arg2[%c0_8, %c0_9, %c0_10] : memref<4x4x8xf32, #tpu.memory_space<vmem>>, vector<1x4x8xf32>
    %9 = vector.shape_cast %8 : vector<1x4x8xf32> to vector<4x8xf32>
    %cst = arith.constant dense<0.000000e+00> : vector<128x8xf32>
    %10 = tpu.matmul %1, %9, %cst {dimension_numbers = #tpu.dot_dimension_numbers<[1], [0], [0], [1], [0, 0, 1, 1], [], []>} : vector<128x4xf32>, vector<4x8xf32>, vector<128x8xf32> -> vector<128x8xf32>
    %c1 = arith.constant 1 : index
    %c0_11 = arith.constant 0 : index
    %c0_12 = arith.constant 0 : index
    %11 = vector.load %arg2[%c1, %c0_11, %c0_12] : memref<4x4x8xf32, #tpu.memory_space<vmem>>, vector<1x4x8xf32>
    %12 = vector.shape_cast %11 : vector<1x4x8xf32> to vector<4x8xf32>
    %cst_13 = arith.constant dense<0.000000e+00> : vector<128x8xf32>
    %13 = tpu.matmul %3, %12, %cst_13 {dimension_numbers = #tpu.dot_dimension_numbers<[1], [0], [0], [1], [0, 0, 1, 1], [], []>} : vector<128x4xf32>, vector<4x8xf32>, vector<128x8xf32> -> vector<128x8xf32>
    %14 = arith.addf %10, %13 : vector<128x8xf32>
    %c2 = arith.constant 2 : index
    %c0_14 = arith.constant 0 : index
    %c0_15 = arith.constant 0 : index
    %15 = vector.load %arg2[%c2, %c0_14, %c0_15] : memref<4x4x8xf32, #tpu.memory_space<vmem>>, vector<1x4x8xf32>
    %16 = vector.shape_cast %15 : vector<1x4x8xf32> to vector<4x8xf32>
    %cst_16 = arith.constant dense<0.000000e+00> : vector<128x8xf32>
    %17 = tpu.matmul %5, %16, %cst_16 {dimension_numbers = #tpu.dot_dimension_numbers<[1], [0], [0], [1], [0, 0, 1, 1], [], []>} : vector<128x4xf32>, vector<4x8xf32>, vector<128x8xf32> -> vector<128x8xf32>
    %18 = arith.addf %14, %17 : vector<128x8xf32>
    %c3 = arith.constant 3 : index
    %c0_17 = arith.constant 0 : index
    %c0_18 = arith.constant 0 : index
    %19 = vector.load %arg2[%c3, %c0_17, %c0_18] : memref<4x4x8xf32, #tpu.memory_space<vmem>>, vector<1x4x8xf32>
    %20 = vector.shape_cast %19 : vector<1x4x8xf32> to vector<4x8xf32>
    %cst_19 = arith.constant dense<0.000000e+00> : vector<128x8xf32>
    %21 = tpu.matmul %7, %20, %cst_19 {dimension_numbers = #tpu.dot_dimension_numbers<[1], [0], [0], [1], [0, 0, 1, 1], [], []>} : vector<128x4xf32>, vector<4x8xf32>, vector<128x8xf32> -> vector<128x8xf32>
    %22 = arith.addf %18, %21 : vector<128x8xf32>
    %c0_20 = arith.constant 0 : index
    %c0_21 = arith.constant 0 : index
    %23 = vector.load %arg3[%c0_20, %c0_21] : memref<1x8xf32, #tpu.memory_space<vmem>>, vector<1x8xf32>
    %24 = vector.broadcast %23 : vector<1x8xf32> to vector<128x8xf32>
    %25 = arith.addf %22, %24 : vector<128x8xf32>
    %cst_22 = arith.constant 0.000000e+00 : f32
    %26 = vector.broadcast %cst_22 : f32 to vector<128x8xf32>
    %27 = arith.maximumf %25, %26 : vector<128x8xf32>
    %28 = vector.extract_strided_slice %27 {offsets = [0, 0], sizes = [32, 8], strides = [1, 1]} : vector<128x8xf32> to vector<32x8xf32>
    %29 = vector.extract_strided_slice %27 {offsets = [32, 0], sizes = [32, 8], strides = [1, 1]} : vector<128x8xf32> to vector<32x8xf32>
    %30 = vector.extract_strided_slice %27 {offsets = [64, 0], sizes = [32, 8], strides = [1, 1]} : vector<128x8xf32> to vector<32x8xf32>
    %31 = vector.extract_strided_slice %27 {offsets = [96, 0], sizes = [32, 8], strides = [1, 1]} : vector<128x8xf32> to vector<32x8xf32>
    %c0_23 = arith.constant 0 : index
    %c0_24 = arith.constant 0 : index
    %c0_25 = arith.constant 0 : index
    %32 = vector.load %arg4[%c0_23, %c0_24, %c0_25] : memref<4x8x16xf32, #tpu.memory_space<vmem>>, vector<1x8x16xf32>
    %33 = vector.shape_cast %32 : vector<1x8x16xf32> to vector<8x16xf32>
    %cst_26 = arith.constant dense<0.000000e+00> : vector<32x16xf32>
    %34 = tpu.matmul %28, %33, %cst_26 {dimension_numbers = #tpu.dot_dimension_numbers<[1], [0], [0], [1], [0, 0, 1, 1], [], []>} : vector<32x8xf32>, vector<8x16xf32>, vector<32x16xf32> -> vector<32x16xf32>
    %c1_27 = arith.constant 1 : index
    %c0_28 = arith.constant 0 : index
    %c0_29 = arith.constant 0 : index
    %35 = vector.load %arg4[%c1_27, %c0_28, %c0_29] : memref<4x8x16xf32, #tpu.memory_space<vmem>>, vector<1x8x16xf32>
    %36 = vector.shape_cast %35 : vector<1x8x16xf32> to vector<8x16xf32>
    %cst_30 = arith.constant dense<0.000000e+00> : vector<32x16xf32>
    %37 = tpu.matmul %29, %36, %cst_30 {dimension_numbers = #tpu.dot_dimension_numbers<[1], [0], [0], [1], [0, 0, 1, 1], [], []>} : vector<32x8xf32>, vector<8x16xf32>, vector<32x16xf32> -> vector<32x16xf32>
    %38 = arith.addf %34, %37 : vector<32x16xf32>
    %c2_31 = arith.constant 2 : index
    %c0_32 = arith.constant 0 : index
    %c0_33 = arith.constant 0 : index
    %39 = vector.load %arg4[%c2_31, %c0_32, %c0_33] : memref<4x8x16xf32, #tpu.memory_space<vmem>>, vector<1x8x16xf32>
    %40 = vector.shape_cast %39 : vector<1x8x16xf32> to vector<8x16xf32>
    %cst_34 = arith.constant dense<0.000000e+00> : vector<32x16xf32>
    %41 = tpu.matmul %30, %40, %cst_34 {dimension_numbers = #tpu.dot_dimension_numbers<[1], [0], [0], [1], [0, 0, 1, 1], [], []>} : vector<32x8xf32>, vector<8x16xf32>, vector<32x16xf32> -> vector<32x16xf32>
    %42 = arith.addf %38, %41 : vector<32x16xf32>
    %c3_35 = arith.constant 3 : index
    %c0_36 = arith.constant 0 : index
    %c0_37 = arith.constant 0 : index
    %43 = vector.load %arg4[%c3_35, %c0_36, %c0_37] : memref<4x8x16xf32, #tpu.memory_space<vmem>>, vector<1x8x16xf32>
    %44 = vector.shape_cast %43 : vector<1x8x16xf32> to vector<8x16xf32>
    %cst_38 = arith.constant dense<0.000000e+00> : vector<32x16xf32>
    %45 = tpu.matmul %31, %44, %cst_38 {dimension_numbers = #tpu.dot_dimension_numbers<[1], [0], [0], [1], [0, 0, 1, 1], [], []>} : vector<32x8xf32>, vector<8x16xf32>, vector<32x16xf32> -> vector<32x16xf32>
    %46 = arith.addf %42, %45 : vector<32x16xf32>
    %c0_39 = arith.constant 0 : index
    %c0_40 = arith.constant 0 : index
    %47 = vector.load %arg5[%c0_39, %c0_40] : memref<1x16xf32, #tpu.memory_space<vmem>>, vector<1x16xf32>
    %48 = vector.broadcast %47 : vector<1x16xf32> to vector<32x16xf32>
    %49 = arith.addf %46, %48 : vector<32x16xf32>
    %cst_41 = arith.constant 0.000000e+00 : f32
    %50 = vector.broadcast %cst_41 : f32 to vector<32x16xf32>
    %51 = arith.maximumf %49, %50 : vector<32x16xf32>
    %52 = vector.extract_strided_slice %51 {offsets = [0, 0], sizes = [8, 16], strides = [1, 1]} : vector<32x16xf32> to vector<8x16xf32>
    %53 = vector.extract_strided_slice %51 {offsets = [8, 0], sizes = [8, 16], strides = [1, 1]} : vector<32x16xf32> to vector<8x16xf32>
    %54 = vector.extract_strided_slice %51 {offsets = [16, 0], sizes = [8, 16], strides = [1, 1]} : vector<32x16xf32> to vector<8x16xf32>
    %55 = vector.extract_strided_slice %51 {offsets = [24, 0], sizes = [8, 16], strides = [1, 1]} : vector<32x16xf32> to vector<8x16xf32>
    %c0_42 = arith.constant 0 : index
    %c0_43 = arith.constant 0 : index
    %c0_44 = arith.constant 0 : index
    %56 = vector.load %arg6[%c0_42, %c0_43, %c0_44] : memref<4x16x32xf32, #tpu.memory_space<vmem>>, vector<1x16x32xf32>
    %57 = vector.shape_cast %56 : vector<1x16x32xf32> to vector<16x32xf32>
    %cst_45 = arith.constant dense<0.000000e+00> : vector<8x32xf32>
    %58 = tpu.matmul %52, %57, %cst_45 {dimension_numbers = #tpu.dot_dimension_numbers<[1], [0], [0], [1], [0, 0, 1, 1], [], []>} : vector<8x16xf32>, vector<16x32xf32>, vector<8x32xf32> -> vector<8x32xf32>
    %c1_46 = arith.constant 1 : index
    %c0_47 = arith.constant 0 : index
    %c0_48 = arith.constant 0 : index
    %59 = vector.load %arg6[%c1_46, %c0_47, %c0_48] : memref<4x16x32xf32, #tpu.memory_space<vmem>>, vector<1x16x32xf32>
    %60 = vector.shape_cast %59 : vector<1x16x32xf32> to vector<16x32xf32>
    %cst_49 = arith.constant dense<0.000000e+00> : vector<8x32xf32>
    %61 = tpu.matmul %53, %60, %cst_49 {dimension_numbers = #tpu.dot_dimension_numbers<[1], [0], [0], [1], [0, 0, 1, 1], [], []>} : vector<8x16xf32>, vector<16x32xf32>, vector<8x32xf32> -> vector<8x32xf32>
    %62 = arith.addf %58, %61 : vector<8x32xf32>
    %c2_50 = arith.constant 2 : index
    %c0_51 = arith.constant 0 : index
    %c0_52 = arith.constant 0 : index
    %63 = vector.load %arg6[%c2_50, %c0_51, %c0_52] : memref<4x16x32xf32, #tpu.memory_space<vmem>>, vector<1x16x32xf32>
    %64 = vector.shape_cast %63 : vector<1x16x32xf32> to vector<16x32xf32>
    %cst_53 = arith.constant dense<0.000000e+00> : vector<8x32xf32>
    %65 = tpu.matmul %54, %64, %cst_53 {dimension_numbers = #tpu.dot_dimension_numbers<[1], [0], [0], [1], [0, 0, 1, 1], [], []>} : vector<8x16xf32>, vector<16x32xf32>, vector<8x32xf32> -> vector<8x32xf32>
    %66 = arith.addf %62, %65 : vector<8x32xf32>
    %c3_54 = arith.constant 3 : index
    %c0_55 = arith.constant 0 : index
    %c0_56 = arith.constant 0 : index
    %67 = vector.load %arg6[%c3_54, %c0_55, %c0_56] : memref<4x16x32xf32, #tpu.memory_space<vmem>>, vector<1x16x32xf32>
    %68 = vector.shape_cast %67 : vector<1x16x32xf32> to vector<16x32xf32>
    %cst_57 = arith.constant dense<0.000000e+00> : vector<8x32xf32>
    %69 = tpu.matmul %55, %68, %cst_57 {dimension_numbers = #tpu.dot_dimension_numbers<[1], [0], [0], [1], [0, 0, 1, 1], [], []>} : vector<8x16xf32>, vector<16x32xf32>, vector<8x32xf32> -> vector<8x32xf32>
    %70 = arith.addf %66, %69 : vector<8x32xf32>
    %c0_58 = arith.constant 0 : index
    %c0_59 = arith.constant 0 : index
    %71 = vector.load %arg7[%c0_58, %c0_59] : memref<1x32xf32, #tpu.memory_space<vmem>>, vector<1x32xf32>
    %72 = vector.broadcast %71 : vector<1x32xf32> to vector<8x32xf32>
    %73 = arith.addf %70, %72 : vector<8x32xf32>
    %cst_60 = arith.constant 0.000000e+00 : f32
    %74 = vector.broadcast %cst_60 : f32 to vector<8x32xf32>
    %75 = arith.maximumf %73, %74 : vector<8x32xf32>
    %c0_61 = arith.constant 0 : index
    %c0_62 = arith.constant 0 : index
    %76 = vector.load %arg8[%c0_61, %c0_62] : memref<8x32xf32, #tpu.memory_space<vmem>>, vector<8x32xf32>
    tpu.vector_store %arg8[%c0_61, %c0_62], %75 {strides = array<i32>} : memref<8x32xf32, #tpu.memory_space<vmem>>, vector<8x32xf32>,
    return
  }
  func.func @transform_0(%arg0: i32) -> (i32, i32, i32) {
    %c0_i32 = arith.constant 0 : i32
    %c0_i32_0 = arith.constant 0 : i32
    %c0_i32_1 = arith.constant 0 : i32
    return %c0_i32, %arg0, %c0_i32_0 : i32, i32, i32
  }
  func.func @transform_1(%arg0: i32) -> (i32, i32, i32) {
    %c0_i32 = arith.constant 0 : i32
    %c0_i32_0 = arith.constant 0 : i32
    %c0_i32_1 = arith.constant 0 : i32
    %c0_i32_2 = arith.constant 0 : i32
    return %c0_i32, %c0_i32_0, %c0_i32_1 : i32, i32, i32
  }
  func.func @transform_2(%arg0: i32) -> (i32, i32) {
    %c0_i32 = arith.constant 0 : i32
    %c0_i32_0 = arith.constant 0 : i32
    %c0_i32_1 = arith.constant 0 : i32
    return %c0_i32, %c0_i32_0 : i32, i32
  }
  func.func @transform_3(%arg0: i32) -> (i32, i32, i32) {
    %c0_i32 = arith.constant 0 : i32
    %c0_i32_0 = arith.constant 0 : i32
    %c0_i32_1 = arith.constant 0 : i32
    %c0_i32_2 = arith.constant 0 : i32
    return %c0_i32, %c0_i32_0, %c0_i32_1 : i32, i32, i32
  }
  func.func @transform_4(%arg0: i32) -> (i32, i32) {
    %c0_i32 = arith.constant 0 : i32
    %c0_i32_0 = arith.constant 0 : i32
    %c0_i32_1 = arith.constant 0 : i32
    return %c0_i32, %c0_i32_0 : i32, i32
  }
  func.func @transform_5(%arg0: i32) -> (i32, i32, i32) {
    %c0_i32 = arith.constant 0 : i32
    %c0_i32_0 = arith.constant 0 : i32
    %c0_i32_1 = arith.constant 0 : i32
    %c0_i32_2 = arith.constant 0 : i32
    return %c0_i32, %c0_i32_0, %c0_i32_1 : i32, i32, i32
  }
  func.func @transform_6(%arg0: i32) -> (i32, i32) {
    %c0_i32 = arith.constant 0 : i32
    %c0_i32_0 = arith.constant 0 : i32
    %c0_i32_1 = arith.constant 0 : i32
    return %c0_i32, %c0_i32_0 : i32, i32
  }
  func.func @transform_7(%arg0: i32) -> (i32, i32) {
    %c0_i32 = arith.constant 0 : i32
    %c0_i32_0 = arith.constant 0 : i32
    return %arg0, %c0_i32 : i32, i32
  }
}

</mosaic_0001>

<bundles_post_ra>
// kernel: down_head_8x_forward.1
= control target key start
LH: loop header
LB: loop body
LE: loop exit
PB: predicated region body
PF: predicated region fallthrough
CT: control target
= control target key end

     0   :  { %vm146_vm0 = vcmask 1043456   ;;  %vm97_vm1 = vcmask 31744   ;;  %s1530_s0 = inlined_call_operand.vmem [shape: f32[64,8,4], index: 0, kind: input, shape index: {}]   ;;  %s1531_s1 = inlined_call_operand.vmem [shape: f32[4,4,8], index: 1, kind: input, shape index: {}]   ;;  %s1532_s2 = inlined_call_operand.vmem [shape: f32[1,8], index: 2, kind: input, shape index: {}]   ;;  %s1533_s3 = inlined_call_operand.vmem [shape: f32[4,8,16], index: 3, kind: input, shape index: {}]   ;;  %s1534_s4 = inlined_call_operand.vmem [shape: f32[1,16], index: 4, kind: input, shape index: {}]   ;;  %s1535_s5 = inlined_call_operand.vmem [shape: f32[4,16,32], index: 5, kind: input, shape index: {}]   ;;  %s1536_s6 = inlined_call_operand.vmem [shape: f32[1,32], index: 6, kind: input, shape index: {}]   ;;  %s1537_s7 = inlined_call_operand.hbm [shape: f32[8,32], index: 7, kind: output, shape index: {}]  }
   0x1   :  { %v1040_v0 = vld [vmem:[%s1531_s1 + $0x8] sm:$0xf]  ;;  %v973_v1 = vld [vmem:[%s1530_s0 + $0x100] sm:$0xff]  ;;  %v1058_v3 = vld [vmem:[%s1531_s1 + $0xc] sm:$0xf] }
   0x2   :  { %v989_v2 = vld [vmem:[%s1530_s0 + $0x180] sm:$0xff]  ;;  %1041 = vmatpush.msk.msra.mxu2 %vm146_vm0, %v1040_v0  ;;  %1059 = vmatpush.msk.msra.mxu3 %vm146_vm0, %v1058_v3  ;;  %v974_v8 = vld [vmem:[%s1530_s0 + $0x108] sm:$0xff] }
   0x3   :  { %v1005_v4 = vld [vmem:[%s1531_s1 + $0x4] sm:$0xf]  ;;  %v94_v5 = vld [vmem:[%s1531_s1] sm:$0xf]  ;;  %1042 = vmatmul.msk.f32.vlgmr.msra.gmra.mxu2 %vm97_vm1, %v973_v1  ;;  %1060 = vmatmul.msk.f32.vlgmr.msra.gmra.mxu3 %vm97_vm1, %v989_v2  ;;  %v990_v9 = vld [vmem:[%s1530_s0 + $0x188] sm:$0xff] }
   0x4   :  { %v957_v6 = vld [vmem:[%s1530_s0 + $0x80] sm:$0xff]  ;;  %1006 = vmatpush.msk.msra.mxu0 %vm146_vm0, %v1005_v4  ;;  %1023 = vmatpush.msk.msra.mxu1 %vm146_vm0, %v94_v5  ;;  %v958_v10 = vld [vmem:[%s1530_s0 + $0x88] sm:$0xff] }
   0x5   :  { %v27_v7 = vld [vmem:[%s1530_s0] sm:$0xff]  ;;  %1007 = vmatmul.msk.f32.vlgmr.msra.gmra.mxu0 %vm97_vm1, %v957_v6 }
   0x6   :  { %1024 = vmatmul.msk.f32.vlgmr.msra.gmra.mxu1 %vm97_vm1, %v27_v7 }
   0x7   :  { %12 = vsyncpa [#allocation3], 0  ;;  %v28_v11 = vld [vmem:[%s1530_s0 + $0x8] sm:$0xff]  ;;  %v975_v12 = vld [vmem:[%s1530_s0 + $0x110] sm:$0xff]  ;;  %vm638_vm2 = vcmask 64512   ;;  %vm832_vm3 = vcmask 130048  }
   0x8   :  { %v991_v13 = vld [vmem:[%s1530_s0 + $0x190] sm:$0xff]  ;;  %v976_v16 = vld [vmem:[%s1530_s0 + $0x118] sm:$0xff]  ;;  %v977_v20 = vld [vmem:[%s1530_s0 + $0x120] sm:$0xff]  ;;  %s1135_s16 = smov [#allocation2]   ;;  %s948_s19 = sshll.u32 %s1537_s7, 4  ;;  %vm939_vm4 = vcmask 261120   ;;  %s949_s19 = int_to_ptr.hbm [resolvable:$true] %s948_s19 }
   0x9   :  { %v959_v14 = vld [vmem:[%s1530_s0 + $0x90] sm:$0xff]  ;;  %v992_v17 = vld [vmem:[%s1530_s0 + $0x198] sm:$0xff]  ;;  %v993_v21 = vld [vmem:[%s1530_s0 + $0x1a0] sm:$0xff]  ;;  %s946_s1 = sshll.u32 %s1135_s16, 4  ;;  %s947_s1 = int_to_ptr.vmem [resolvable:$true] %s946_s1 }
   0xa   :  { %v29_v15 = vld [vmem:[%s1530_s0 + $0x10] sm:$0xff]  ;;  %v960_v18 = vld [vmem:[%s1530_s0 + $0x98] sm:$0xff]  ;;  %v961_v22 = vld [vmem:[%s1530_s0 + $0xa0] sm:$0xff] }
   0xb   :  { %1043 = vmatmul.msk.f32.gmra.mxu2 %vm97_vm1, %v974_v8  ;;  %1061 = vmatmul.msk.f32.gmra.mxu3 %vm97_vm1, %v990_v9  ;;  %v30_v19 = vld [vmem:[%s1530_s0 + $0x18] sm:$0xff]  ;;  %v31_v23 = vld [vmem:[%s1530_s0 + $0x20] sm:$0xff]  ;;  %v978_v24 = vld [vmem:[%s1530_s0 + $0x128] sm:$0xff] }
   0xc   :  { %v994_v25 = vld [vmem:[%s1530_s0 + $0x1a8] sm:$0xff]  ;;  %v979_v28 = vld [vmem:[%s1530_s0 + $0x130] sm:$0xff]  ;;  %v980_v32 = vld [vmem:[%s1530_s0 + $0x138] sm:$0xff] }
   0xd   :  { %1008 = vmatmul.msk.f32.gmra.mxu0 %vm97_vm1, %v958_v10  ;;  %v962_v26 = vld [vmem:[%s1530_s0 + $0xa8] sm:$0xff]  ;;  %v995_v29 = vld [vmem:[%s1530_s0 + $0x1b0] sm:$0xff]  ;;  %v996_v33 = vld [vmem:[%s1530_s0 + $0x1b8] sm:$0xff] }
   0xe   :  { %1025 = vmatmul.msk.f32.gmra.mxu1 %vm97_vm1, %v28_v11  ;;  %v32_v27 = vld [vmem:[%s1530_s0 + $0x28] sm:$0xff]  ;;  %v963_v30 = vld [vmem:[%s1530_s0 + $0xb0] sm:$0xff]  ;;  %v964_v34 = vld [vmem:[%s1530_s0 + $0xb8] sm:$0xff] }
   0xf   :  { %v33_v31 = vld [vmem:[%s1530_s0 + $0x30] sm:$0xff]  ;;  %v34_v35 = vld [vmem:[%s1530_s0 + $0x38] sm:$0xff]  ;;  %v981_v36 = vld [vmem:[%s1530_s0 + $0x140] sm:$0xff] }
  0x10   :  { %v997_v37 = vld [vmem:[%s1530_s0 + $0x1c0] sm:$0xff]  ;;  %v982_v40 = vld [vmem:[%s1530_s0 + $0x148] sm:$0xff]  ;;  %v1085_v44 = vld [vmem:[%s1533_s3 + $0x10] sm:$0xff] }
  0x11   :  { %v965_v38 = vld [vmem:[%s1530_s0 + $0xc0] sm:$0xff]  ;;  %v998_v41 = vld [vmem:[%s1530_s0 + $0x1c8] sm:$0xff]  ;;  %750 = vmatpush.msrb.mxu2 %v1085_v44  ;;  %v1090_v45 = vld [vmem:[%s1533_s3 + $0x18] sm:$0xff] }
  0x12   :  { %v35_v39 = vld [vmem:[%s1530_s0 + $0x40] sm:$0xff]  ;;  %v966_v42 = vld [vmem:[%s1530_s0 + $0xc8] sm:$0xff]  ;;  %797 = vmatpush.msrb.mxu3 %v1090_v45  ;;  %v983_v48 = vld [vmem:[%s1530_s0 + $0x150] sm:$0xff] }
  0x13   :  { %1044 = vmatmul.msk.f32.gmra.mxu2 %vm97_vm1, %v975_v12  ;;  %1062 = vmatmul.msk.f32.gmra.mxu3 %vm97_vm1, %v991_v13  ;;  %v36_v43 = vld [vmem:[%s1530_s0 + $0x48] sm:$0xff]  ;;  %v635_v47 = vld [vmem:[%s1533_s3] sm:$0xff]  ;;  %v999_v49 = vld [vmem:[%s1530_s0 + $0x1d0] sm:$0xff] }
  0x14   :  { %v1076_v46 = vld [vmem:[%s1533_s3 + $0x8] sm:$0xff]  ;;  %707 = vmatpush.msrb.mxu1 %v635_v47  ;;  %v967_v50 = vld [vmem:[%s1530_s0 + $0xd0] sm:$0xff]  ;;  %v984_v52 = vld [vmem:[%s1530_s0 + $0x158] sm:$0xff] }
  0x15   :  { %1009 = vmatmul.msk.f32.gmra.mxu0 %vm97_vm1, %v959_v14  ;;  %v37_v51 = vld [vmem:[%s1530_s0 + $0x50] sm:$0xff]  ;;  %v1000_v53 = vld [vmem:[%s1530_s0 + $0x1d8] sm:$0xff]  ;;  %v985_v56 = vld [vmem:[%s1530_s0 + $0x160] sm:$0xff] }
  0x16   :  { %1026 = vmatmul.msk.f32.gmra.mxu1 %vm97_vm1, %v29_v15  ;;  %666 = vmatpush.msrb.mxu0 %v1076_v46  ;;  %v968_v54 = vld [vmem:[%s1530_s0 + $0xd8] sm:$0xff]  ;;  %v1001_v57 = vld [vmem:[%s1530_s0 + $0x1e0] sm:$0xff]  ;;  %v986_v60 = vld [vmem:[%s1530_s0 + $0x168] sm:$0xff] }
  0x17   :  { %v38_v55 = vld [vmem:[%s1530_s0 + $0x58] sm:$0xff]  ;;  %v969_v58 = vld [vmem:[%s1530_s0 + $0xe0] sm:$0xff]  ;;  %v1002_v61 = vld [vmem:[%s1530_s0 + $0x1e8] sm:$0xff] }
  0x18   :  { %v39_v59 = vld [vmem:[%s1530_s0 + $0x60] sm:$0xff]  ;;  %v970_v62 = vld [vmem:[%s1530_s0 + $0xe8] sm:$0xff]  ;;  %v987_v0 = vld [vmem:[%s1530_s0 + $0x170] sm:$0xff] }
  0x19   :  { %v40_v63 = vld [vmem:[%s1530_s0 + $0x68] sm:$0xff]  ;;  %v1003_v1 = vld [vmem:[%s1530_s0 + $0x1f0] sm:$0xff]  ;;  %v988_v4 = vld [vmem:[%s1530_s0 + $0x178] sm:$0xff] }
  0x1a   :  { %v971_v2 = vld [vmem:[%s1530_s0 + $0xf0] sm:$0xff]  ;;  %v1004_v5 = vld [vmem:[%s1530_s0 + $0x1f8] sm:$0xff]  ;;  %v1459_v14 = vld [vmem:[%s1532_s2] ss:$0 sm:$0xff] }
  0x1b   :  { %1045 = vmatmul.msk.f32.gmra.mxu2 %vm97_vm1, %v976_v16  ;;  %1063 = vmatmul.msk.f32.gmra.mxu3 %vm97_vm1, %v992_v17  ;;  %v41_v3 = vld [vmem:[%s1530_s0 + $0x70] sm:$0xff]  ;;  %v972_v6 = vld [vmem:[%s1530_s0 + $0xf8] sm:$0xff] }
  0x1c   :  { %v42_v7 = vld [vmem:[%s1530_s0 + $0x78] sm:$0xff] }
  0x1d   :  { %1010 = vmatmul.msk.f32.gmra.mxu0 %vm97_vm1, %v960_v18 }
  0x1e   :  { %1027 = vmatmul.msk.f32.gmra.mxu1 %vm97_vm1, %v30_v19 }
  0x23   :  { %1046 = vmatmul.msk.f32.gmra.mxu2 %vm97_vm1, %v977_v20  ;;  %1064 = vmatmul.msk.f32.gmra.mxu3 %vm97_vm1, %v993_v21 }
  0x25   :  { %1011 = vmatmul.msk.f32.gmra.mxu0 %vm97_vm1, %v961_v22 }
  0x26   :  { %1028 = vmatmul.msk.f32.gmra.mxu1 %vm97_vm1, %v31_v23 }
  0x2b   :  { %1047 = vmatmul.msk.f32.gmra.mxu2 %vm97_vm1, %v978_v24  ;;  %1065 = vmatmul.msk.f32.gmra.mxu3 %vm97_vm1, %v994_v25 }
  0x2d   :  { %1012 = vmatmul.msk.f32.gmra.mxu0 %vm97_vm1, %v962_v26 }
  0x2e   :  { %1029 = vmatmul.msk.f32.gmra.mxu1 %vm97_vm1, %v32_v27 }
  0x33   :  { %1048 = vmatmul.msk.f32.gmra.mxu2 %vm97_vm1, %v979_v28  ;;  %1066 = vmatmul.msk.f32.gmra.mxu3 %vm97_vm1, %v995_v29 }
  0x35   :  { %1013 = vmatmul.msk.f32.gmra.mxu0 %vm97_vm1, %v963_v30 }
  0x36   :  { %1030 = vmatmul.msk.f32.gmra.mxu1 %vm97_vm1, %v33_v31 }
  0x3b   :  { %1049 = vmatmul.msk.f32.gmra.mxu2 %vm97_vm1, %v980_v32  ;;  %1067 = vmatmul.msk.f32.gmra.mxu3 %vm97_vm1, %v996_v33 }
  0x3d   :  { %1014 = vmatmul.msk.f32.gmra.mxu0 %vm97_vm1, %v964_v34 }
  0x3e   :  { %1031 = vmatmul.msk.f32.gmra.mxu1 %vm97_vm1, %v34_v35 }
  0x43   :  { %1050 = vmatmul.msk.f32.gmra.mxu2 %vm97_vm1, %v981_v36  ;;  %1068 = vmatmul.msk.f32.gmra.mxu3 %vm97_vm1, %v997_v37 }
  0x45   :  { %1015 = vmatmul.msk.f32.gmra.mxu0 %vm97_vm1, %v965_v38 }
  0x46   :  { %1032 = vmatmul.msk.f32.gmra.mxu1 %vm97_vm1, %v35_v39 }
  0x4b   :  { %1051 = vmatmul.msk.f32.gmra.mxu2 %vm97_vm1, %v982_v40  ;;  %1069 = vmatmul.msk.f32.gmra.mxu3 %vm97_vm1, %v998_v41 }
  0x4d   :  { %1016 = vmatmul.msk.f32.gmra.mxu0 %vm97_vm1, %v966_v42 }
  0x4e   :  { %1033 = vmatmul.msk.f32.gmra.mxu1 %vm97_vm1, %v36_v43 }
  0x53   :  { %1052 = vmatmul.msk.f32.gmra.mxu2 %vm97_vm1, %v983_v48  ;;  %1070 = vmatmul.msk.f32.gmra.mxu3 %vm97_vm1, %v999_v49 }
  0x55   :  { %1017 = vmatmul.msk.f32.gmra.mxu0 %vm97_vm1, %v967_v50 }
  0x56   :  { %1034 = vmatmul.msk.f32.gmra.mxu1 %vm97_vm1, %v37_v51 }
  0x5b   :  { %1053 = vmatmul.msk.f32.gmra.mxu2 %vm97_vm1, %v984_v52  ;;  %1071 = vmatmul.msk.f32.gmra.mxu3 %vm97_vm1, %v1000_v53 }
  0x5d   :  { %1018 = vmatmul.msk.f32.gmra.mxu0 %vm97_vm1, %v968_v54 }
  0x5e   :  { %1035 = vmatmul.msk.f32.gmra.mxu1 %vm97_vm1, %v38_v55 }
  0x63   :  { %1054 = vmatmul.msk.f32.gmra.mxu2 %vm97_vm1, %v985_v56  ;;  %1072 = vmatmul.msk.f32.gmra.mxu3 %vm97_vm1, %v1001_v57 }
  0x65   :  { %1019 = vmatmul.msk.f32.gmra.mxu0 %vm97_vm1, %v969_v58 }
  0x66   :  { %1036 = vmatmul.msk.f32.gmra.mxu1 %vm97_vm1, %v39_v59 }
  0x6b   :  { %1055 = vmatmul.msk.f32.gmra.mxu2 %vm97_vm1, %v986_v60  ;;  %1073 = vmatmul.msk.f32.gmra.mxu3 %vm97_vm1, %v1002_v61 }
  0x6d   :  { %1020 = vmatmul.msk.f32.gmra.mxu0 %vm97_vm1, %v970_v62 }
  0x6e   :  { %1037 = vmatmul.msk.f32.gmra.mxu1 %vm97_vm1, %v40_v63 }
  0x73   :  { %1056 = vmatmul.msk.f32.gmra.mxu2 %vm97_vm1, %v987_v0  ;;  %1074 = vmatmul.msk.f32.gmra.mxu3 %vm97_vm1, %v1003_v1 }
  0x75   :  { %1021 = vmatmul.msk.f32.gmra.mxu0 %vm97_vm1, %v971_v2 }
  0x76   :  { %1038 = vmatmul.msk.f32.gmra.mxu1 %vm97_vm1, %v41_v3 }
  0x7b   :  { %1057 = vmatmul.msk.f32.gmra.mxu2 %vm97_vm1, %v988_v4  ;;  %1075 = vmatmul.msk.f32.gmra.mxu3 %vm97_vm1, %v1004_v5 }
  0x7d   :  { %1022 = vmatmul.msk.f32.gmra.mxu0 %vm97_vm1, %v972_v6 }
  0x7e   :  { %1039 = vmatmul.msk.f32.gmra.mxu1 %vm97_vm1, %v42_v7 }
  0x82   :  { %v167_v8 = vpop.f32.mrf.mxu0 }
  0x83   :  { %v283_v9 = vpop.f32.mrf.mxu1 }
  0x84   :  { %v284_v10 = vadd.f32 %v283_v9, %v167_v8 }
  0x86   :  { %v401_v11 = vpop.f32.mrf.mxu2  ;;  %v535_v13 = vpop.f32.mrf.mxu3 }
  0x87   :  { %v449_v12 = vadd.f32 %v401_v11, %v284_v10 }
  0x89   :  { %v583_v15 = vadd.f32 %v535_v13, %v449_v12 }
  0x8a   :  { %v170_v16 = vpop.f32.mrf.mxu0 }
  0x8b   :  { %v603_v17 = vadd.f32 %v1459_v14, %v583_v15  ;;  %v286_v18 = vpop.f32.mrf.mxu1 }
  0x8c   :  { %v287_v19 = vadd.f32 %v286_v18, %v170_v16 }
  0x8d   :  { %v619_v20 = vmax.f32 %v603_v17, 0.0 }
  0x8e   :  { %v404_v21 = vpop.f32.mrf.mxu2  ;;  %v538_v23 = vpop.f32.mrf.mxu3 }
  0x8f   :  { %v450_v22 = vadd.f32 %v404_v21, %v287_v19  ;;  %1081 = vmatmul.msk.f32.vlgmr.msrb.gmra.mxu1 %vm638_vm2, %v619_v20 }
  0x91   :  { %v584_v24 = vadd.f32 %v538_v23, %v450_v22 }
  0x92   :  { %v173_v25 = vpop.f32.mrf.mxu0 }
  0x93   :  { %v604_v26 = vadd.f32 %v1459_v14, %v584_v24  ;;  %v289_v27 = vpop.f32.mrf.mxu1 }
  0x94   :  { %v290_v28 = vadd.f32 %v289_v27, %v173_v25 }
  0x95   :  { %v620_v29 = vmax.f32 %v604_v26, 0.0 }
  0x96   :  { %v407_v30 = vpop.f32.mrf.mxu2  ;;  %v541_v32 = vpop.f32.mrf.mxu3 }
  0x97   :  { %v451_v31 = vadd.f32 %v407_v30, %v290_v28  ;;  %1082 = vmatmul.msk.f32.gmra.mxu1 %vm638_vm2, %v620_v29 }
  0x99   :  { %v585_v33 = vadd.f32 %v541_v32, %v451_v31 }
  0x9a   :  { %v176_v34 = vpop.f32.mrf.mxu0 }
  0x9b   :  { %v605_v35 = vadd.f32 %v1459_v14, %v585_v33  ;;  %v292_v36 = vpop.f32.mrf.mxu1 }
  0x9c   :  { %v293_v37 = vadd.f32 %v292_v36, %v176_v34 }
  0x9d   :  { %v621_v38 = vmax.f32 %v605_v35, 0.0 }
  0x9e   :  { %v410_v39 = vpop.f32.mrf.mxu2  ;;  %v544_v41 = vpop.f32.mrf.mxu3 }
  0x9f   :  { %v452_v40 = vadd.f32 %v410_v39, %v293_v37  ;;  %1083 = vmatmul.msk.f32.gmra.mxu1 %vm638_vm2, %v621_v38 }
  0xa1   :  { %v586_v42 = vadd.f32 %v544_v41, %v452_v40 }
  0xa2   :  { %v179_v43 = vpop.f32.mrf.mxu0 }
  0xa3   :  { %v606_v44 = vadd.f32 %v1459_v14, %v586_v42  ;;  %v295_v45 = vpop.f32.mrf.mxu1 }
  0xa4   :  { %v296_v46 = vadd.f32 %v295_v45, %v179_v43 }
  0xa5   :  { %v622_v47 = vmax.f32 %v606_v44, 0.0 }
  0xa6   :  { %v413_v48 = vpop.f32.mrf.mxu2  ;;  %v547_v50 = vpop.f32.mrf.mxu3 }
  0xa7   :  { %v453_v49 = vadd.f32 %v413_v48, %v296_v46  ;;  %1084 = vmatmul.msk.f32.gmra.mxu1 %vm638_vm2, %v622_v47 }
  0xa9   :  { %v587_v51 = vadd.f32 %v547_v50, %v453_v49 }
  0xaa   :  { %v182_v52 = vpop.f32.mrf.mxu0 }
  0xab   :  { %v607_v53 = vadd.f32 %v1459_v14, %v587_v51  ;;  %v298_v54 = vpop.f32.mrf.mxu1 }
  0xac   :  { %v299_v55 = vadd.f32 %v298_v54, %v182_v52 }
  0xad   :  { %v623_v56 = vmax.f32 %v607_v53, 0.0 }
  0xae   :  { %v416_v57 = vpop.f32.mrf.mxu2  ;;  %v550_v59 = vpop.f32.mrf.mxu3 }
  0xaf   :  { %v454_v58 = vadd.f32 %v416_v57, %v299_v55  ;;  %1077 = vmatmul.msk.f32.vlgmr.msrb.gmra.mxu0 %vm638_vm2, %v623_v56 }
  0xb1   :  { %v588_v60 = vadd.f32 %v550_v59, %v454_v58 }
  0xb2   :  { %v185_v61 = vpop.f32.mrf.mxu0 }
  0xb3   :  { %v608_v62 = vadd.f32 %v1459_v14, %v588_v60  ;;  %v301_v63 = vpop.f32.mrf.mxu1 }
  0xb4   :  { %v302_v0 = vadd.f32 %v301_v63, %v185_v61 }
  0xb5   :  { %v624_v1 = vmax.f32 %v608_v62, 0.0 }
  0xb6   :  { %v419_v2 = vpop.f32.mrf.mxu2  ;;  %v553_v4 = vpop.f32.mrf.mxu3 }
  0xb7   :  { %v455_v3 = vadd.f32 %v419_v2, %v302_v0  ;;  %1078 = vmatmul.msk.f32.gmra.mxu0 %vm638_vm2, %v624_v1 }
  0xb9   :  { %v589_v5 = vadd.f32 %v553_v4, %v455_v3 }
  0xba   :  { %v188_v6 = vpop.f32.mrf.mxu0 }
  0xbb   :  { %v609_v7 = vadd.f32 %v1459_v14, %v589_v5  ;;  %v304_v8 = vpop.f32.mrf.mxu1 }
  0xbc   :  { %v305_v9 = vadd.f32 %v304_v8, %v188_v6 }
  0xbd   :  { %v625_v10 = vmax.f32 %v609_v7, 0.0 }
  0xbe   :  { %v422_v11 = vpop.f32.mrf.mxu2  ;;  %v556_v13 = vpop.f32.mrf.mxu3 }
  0xbf   :  { %v456_v12 = vadd.f32 %v422_v11, %v305_v9  ;;  %1079 = vmatmul.msk.f32.gmra.mxu0 %vm638_vm2, %v625_v10 }
  0xc1   :  { %v590_v15 = vadd.f32 %v556_v13, %v456_v12 }
  0xc2   :  { %v191_v16 = vpop.f32.mrf.mxu0 }
  0xc3   :  { %v610_v17 = vadd.f32 %v1459_v14, %v590_v15  ;;  %v307_v18 = vpop.f32.mrf.mxu1 }
  0xc4   :  { %v308_v19 = vadd.f32 %v307_v18, %v191_v16 }
  0xc5   :  { %v626_v20 = vmax.f32 %v610_v17, 0.0 }
  0xc6   :  { %v425_v21 = vpop.f32.mrf.mxu2  ;;  %v559_v23 = vpop.f32.mrf.mxu3 }
  0xc7   :  { %v457_v22 = vadd.f32 %v425_v21, %v308_v19  ;;  %1080 = vmatmul.msk.f32.gmra.mxu0 %vm638_vm2, %v626_v20 }
  0xc9   :  { %v591_v24 = vadd.f32 %v559_v23, %v457_v22 }
  0xca   :  { %v194_v25 = vpop.f32.mrf.mxu0 }
  0xcb   :  { %v611_v26 = vadd.f32 %v1459_v14, %v591_v24  ;;  %v310_v27 = vpop.f32.mrf.mxu1 }
  0xcc   :  { %v311_v28 = vadd.f32 %v310_v27, %v194_v25  ;;  %v1100_v27 = vld [vmem:[%s1535_s5 + $0x28] sm:$0xff] }
  0xcd   :  { %v627_v29 = vmax.f32 %v611_v26, 0.0  ;;  %899 = vmatpush.msra.mxu2 %v1100_v27 }
  0xce   :  { %v428_v30 = vpop.f32.mrf.mxu2  ;;  %v562_v32 = vpop.f32.mrf.mxu3 }
  0xcf   :  { %v458_v31 = vadd.f32 %v428_v30, %v311_v28  ;;  %1086 = vmatmul.msk.f32.vlgmr.msrb.gmra.mxu2 %vm638_vm2, %v627_v29  ;;  %v1103_v28 = vld [vmem:[%s1535_s5 + $0x38] sm:$0xff]  ;;  %v828_v29 = vld [vmem:[%s1535_s5 + $0x8] sm:$0xff]  ;;  %v827_v30 = vld [vmem:[%s1535_s5] sm:$0xff] }
  0xd0   :  { %926 = vmatpush.msra.mxu3 %v1103_v28  ;;  %873 = vmatpush.msra.mxu1 %v828_v29 }
  0xd1   :  { %v592_v33 = vadd.f32 %v562_v32, %v458_v31  ;;  %v1099_v31 = vld [vmem:[%s1535_s5 + $0x20] sm:$0xff]  ;;  %v1095_v32 = vld [vmem:[%s1535_s5 + $0x10] sm:$0xff] }
  0xd2   :  { %v197_v34 = vpop.f32.mrf.mxu0  ;;  %874 = vmatpush.msra.mxu1 %v827_v30  ;;  %900 = vmatpush.msra.mxu2 %v1099_v31 }
  0xd3   :  { %v612_v35 = vadd.f32 %v1459_v14, %v592_v33  ;;  %v313_v36 = vpop.f32.mrf.mxu1  ;;  %v1102_v33 = vld [vmem:[%s1535_s5 + $0x30] sm:$0xff] }
  0xd4   :  { %v314_v37 = vadd.f32 %v313_v36, %v197_v34  ;;  %927 = vmatpush.msra.mxu3 %v1102_v33 }
  0xd5   :  { %v628_v38 = vmax.f32 %v612_v35, 0.0 }
  0xd6   :  { %v431_v39 = vpop.f32.mrf.mxu2  ;;  %v565_v41 = vpop.f32.mrf.mxu3 }
  0xd7   :  { %v459_v40 = vadd.f32 %v431_v39, %v314_v37  ;;  %1087 = vmatmul.msk.f32.gmra.mxu2 %vm638_vm2, %v628_v38 }
  0xd9   :  { %v593_v42 = vadd.f32 %v565_v41, %v459_v40  ;;  %v1107_v41 = vld [vmem:[%s1534_s4] ss:$0 sm:$0xff] }
  0xda   :  { %v200_v43 = vpop.f32.mrf.mxu0 }
  0xdb   :  { %v613_v44 = vadd.f32 %v1459_v14, %v593_v42  ;;  %v316_v45 = vpop.f32.mrf.mxu1 }
  0xdc   :  { %v317_v46 = vadd.f32 %v316_v45, %v200_v43 }
  0xdd   :  { %v629_v47 = vmax.f32 %v613_v44, 0.0 }
  0xde   :  { %v434_v48 = vpop.f32.mrf.mxu2  ;;  %v568_v50 = vpop.f32.mrf.mxu3 }
  0xdf   :  { %v460_v49 = vadd.f32 %v434_v48, %v317_v46  ;;  %1088 = vmatmul.msk.f32.gmra.mxu2 %vm638_vm2, %v629_v47 }
  0xe1   :  { %v594_v51 = vadd.f32 %v568_v50, %v460_v49 }
  0xe2   :  { %v203_v52 = vpop.f32.mrf.mxu0 }
  0xe3   :  { %v614_v53 = vadd.f32 %v1459_v14, %v594_v51  ;;  %v319_v54 = vpop.f32.mrf.mxu1 }
  0xe4   :  { %v320_v55 = vadd.f32 %v319_v54, %v203_v52 }
  0xe5   :  { %v630_v56 = vmax.f32 %v614_v53, 0.0 }
  0xe6   :  { %v437_v57 = vpop.f32.mrf.mxu2  ;;  %v571_v59 = vpop.f32.mrf.mxu3 }
  0xe7   :  { %v461_v58 = vadd.f32 %v437_v57, %v320_v55  ;;  %1089 = vmatmul.msk.f32.gmra.mxu2 %vm638_vm2, %v630_v56 }
  0xe9   :  { %v595_v60 = vadd.f32 %v571_v59, %v461_v58 }
  0xea   :  { %v206_v61 = vpop.f32.mrf.mxu0 }
  0xeb   :  { %v615_v62 = vadd.f32 %v1459_v14, %v595_v60  ;;  %v322_v63 = vpop.f32.mrf.mxu1 }
  0xec   :  { %v323_v0 = vadd.f32 %v322_v63, %v206_v61 }
  0xed   :  { %v631_v1 = vmax.f32 %v615_v62, 0.0 }
  0xee   :  { %v440_v2 = vpop.f32.mrf.mxu2  ;;  %v574_v4 = vpop.f32.mrf.mxu3 }
  0xef   :  { %v462_v3 = vadd.f32 %v440_v2, %v323_v0  ;;  %1091 = vmatmul.msk.f32.vlgmr.msrb.gmra.mxu3 %vm638_vm2, %v631_v1 }
  0xf1   :  { %v596_v5 = vadd.f32 %v574_v4, %v462_v3 }
  0xf2   :  { %v209_v6 = vpop.f32.mrf.mxu0 }
  0xf3   :  { %v616_v7 = vadd.f32 %v1459_v14, %v596_v5  ;;  %v325_v8 = vpop.f32.mrf.mxu1 }
  0xf4   :  { %v326_v9 = vadd.f32 %v325_v8, %v209_v6 }
  0xf5   :  { %v632_v10 = vmax.f32 %v616_v7, 0.0 }
  0xf6   :  { %v443_v11 = vpop.f32.mrf.mxu2  ;;  %v577_v13 = vpop.f32.mrf.mxu3 }
  0xf7   :  { %v463_v12 = vadd.f32 %v443_v11, %v326_v9  ;;  %1092 = vmatmul.msk.f32.gmra.mxu3 %vm638_vm2, %v632_v10 }
  0xf9   :  { %v597_v15 = vadd.f32 %v577_v13, %v463_v12  ;;  %v1108_v12 = vld [vmem:[%s1536_s6] ss:$0 sm:$0xff] }
  0xfa   :  { %v212_v16 = vpop.f32.mrf.mxu0 }
  0xfb   :  { %v617_v17 = vadd.f32 %v1459_v14, %v597_v15  ;;  %v328_v18 = vpop.f32.mrf.mxu1 }
  0xfc   :  { %v329_v19 = vadd.f32 %v328_v18, %v212_v16 }
  0xfd   :  { %v633_v20 = vmax.f32 %v617_v17, 0.0 }
  0xfe   :  { %v446_v21 = vpop.f32.mrf.mxu2  ;;  %v580_v23 = vpop.f32.mrf.mxu3 }
  0xff   :  { %v464_v22 = vadd.f32 %v446_v21, %v329_v19  ;;  %1093 = vmatmul.msk.f32.gmra.mxu3 %vm638_vm2, %v633_v20 }
 0x101   :  { %v598_v24 = vadd.f32 %v580_v23, %v464_v22 }
 0x103   :  { %v618_v25 = vadd.f32 %v1459_v14, %v598_v24  ;;  %v1096_v14 = vld [vmem:[%s1535_s5 + $0x18] sm:$0xff] }
 0x104   :  { %850 = vmatpush.msra.mxu0 %v1096_v14 }
 0x105   :  { %v634_v26 = vmax.f32 %v618_v25, 0.0 }
 0x106   :  { %851 = vmatpush.msra.mxu0 %v1095_v32 }
 0x107   :  { %1094 = vmatmul.msk.f32.gmra.mxu3 %vm638_vm2, %v634_v26 }
 0x10c   :  { %v709_v35 = vpop.f32.mrf.mxu1 }
 0x114   :  { %v712_v39 = vpop.f32.mrf.mxu1 }
 0x11c   :  { %v715_v52 = vpop.f32.mrf.mxu1 }
 0x124   :  { %v718_v62 = vpop.f32.mrf.mxu1 }
 0x12c   :  { %v668_v34 = vpop.f32.mrf.mxu0 }
 0x12d   :  { %v710_v37 = vadd.f32 %v709_v35, %v668_v34 }
 0x134   :  { %v671_v38 = vpop.f32.mrf.mxu0 }
 0x135   :  { %v713_v46 = vadd.f32 %v712_v39, %v671_v38 }
 0x13c   :  { %v674_v49 = vpop.f32.mrf.mxu0 }
 0x13d   :  { %v716_v55 = vadd.f32 %v715_v52, %v674_v49 }
 0x144   :  { %v677_v60 = vpop.f32.mrf.mxu0 }
 0x145   :  { %v719_v0 = vadd.f32 %v718_v62, %v677_v60 }
 0x152   :  { %v752_v36 = vpop.f32.mrf.mxu2 }
 0x153   :  { %v764_v40 = vadd.f32 %v752_v36, %v710_v37 }
 0x15a   :  { %v755_v42 = vpop.f32.mrf.mxu2 }
 0x15b   :  { %v765_v48 = vadd.f32 %v755_v42, %v713_v46 }
 0x162   :  { %v758_v53 = vpop.f32.mrf.mxu2 }
 0x163   :  { %v766_v57 = vadd.f32 %v758_v53, %v716_v55 }
 0x16a   :  { %v761_v63 = vpop.f32.mrf.mxu2 }
 0x16b   :  { %v767_v2 = vadd.f32 %v761_v63, %v719_v0 }
 0x172   :  { %v799_v43 = vpop.f32.mrf.mxu3 }
 0x173   :  { %v811_v44 = vadd.f32 %v799_v43, %v764_v40 }
 0x175   :  { %v819_v45 = vadd.f32 %v1107_v41, %v811_v44 }
 0x177   :  { %v823_v47 = vmax.f32 %v819_v45, 0.0 }
 0x179   :  { %1098 = vmatmul.msk.f32.vlgmr.msra.gmra.mxu1 %vm832_vm3, %v823_v47 }
 0x17a   :  { %v802_v50 = vpop.f32.mrf.mxu3 }
 0x17b   :  { %v812_v51 = vadd.f32 %v802_v50, %v765_v48 }
 0x17d   :  { %v820_v54 = vadd.f32 %v1107_v41, %v812_v51 }
 0x17f   :  { %v824_v56 = vmax.f32 %v820_v54, 0.0 }
 0x181   :  { %1097 = vmatmul.msk.f32.vlgmr.msra.gmra.mxu0 %vm832_vm3, %v824_v56 }
 0x182   :  { %v805_v58 = vpop.f32.mrf.mxu3 }
 0x183   :  { %v813_v59 = vadd.f32 %v805_v58, %v766_v57 }
 0x185   :  { %v821_v61 = vadd.f32 %v1107_v41, %v813_v59 }
 0x187   :  { %v825_v1 = vmax.f32 %v821_v61, 0.0 }
 0x189   :  { %1101 = vmatmul.msk.f32.vlgmr.msra.gmra.mxu2 %vm832_vm3, %v825_v1 }
 0x18a   :  { %v808_v3 = vpop.f32.mrf.mxu3 }
 0x18b   :  { %v814_v4 = vadd.f32 %v808_v3, %v767_v2 }
 0x18d   :  { %v822_v5 = vadd.f32 %v1107_v41, %v814_v4 }
 0x18f   :  { %v826_v6 = vmax.f32 %v822_v5, 0.0 }
 0x191   :  { %1104 = vmatmul.msk.f32.vlgmr.msra.gmra.mxu3 %vm832_vm3, %v826_v6 }
 0x1f6   :  { %v876_v8 = vpop.f32.mrf.mxu1 }
 0x1fe   :  { %v853_v7 = vpop.f32.mrf.mxu0 }
 0x1ff   :  { %v877_v10 = vadd.f32 %v876_v8, %v853_v7 }
 0x20c   :  { %v902_v9 = vpop.f32.mrf.mxu2 }
 0x20d   :  { %v905_v11 = vadd.f32 %v902_v9, %v877_v10 }
 0x214   :  { %v929_v13 = vpop.f32.mrf.mxu3 }
 0x215   :  { %v932_v15 = vadd.f32 %v929_v13, %v905_v11 }
 0x217   :  { %v937_v16 = vadd.f32 %v1108_v12, %v932_v15 }
 0x219   :  { %v938_v17 = vmax.f32 %v937_v16, 0.0 }
 0x21b   :  { %940 = vst.msk [vmem:[#allocation2] sm:$0xff] %vm939_vm4, %v938_v17 }
 0x21c   :  { %951 = dma.vmem_to_hbm [thread:$0]  %s947_s1, 128, %s949_s19, [#allocation3]  }
 0x21d   :  { %1133 = dma.done.wait [#allocation3], 128  }
 0x21e   :  { %1134 = vsyncadd [#allocation3], 4294967168 }
 0x21f   :  { %956 = vsyncpa [#allocation3], 1 }

</bundles_post_ra>
